<compile_context>
chip_gen: v7x
topology: tpu7x:2x2x1
jax: 0.10.0
libtpu: 0.0.40
codegen_flags: <defaults>
</compile_context>

<pallas_src>
import functools

import jax
import jax.numpy as jnp
from jax.experimental import pallas as pl
from jax.experimental.pallas import tpu as pltpu

LANES = 128


def _round_up(x, m):
    return ((x + m - 1) // m) * m


def _rnn_seq_kernel(x_ref, h0_ref, w1x_ref, w1h_ref, b1_ref, w2_ref, b2_ref,
                    w3_ref, b3_ref, o_ref, h_ref):
    """One grid step = one timestep. h_ref is the persistent padded hidden."""
    t = pl.program_id(0)

    @pl.when(t == 0)
    def _init_hidden():
        h_ref[...] = h0_ref[...]

    # hidden1: concat folded into two matmuls (x part + hidden part).
    t1 = (jnp.dot(x_ref[...], w1x_ref[...], preferred_element_type=jnp.float32)
          + jnp.dot(h_ref[...], w1h_ref[...], preferred_element_type=jnp.float32)
          + b1_ref[...])
    # hidden2
    t2 = jnp.dot(t1, w2_ref[...], preferred_element_type=jnp.float32) + b2_ref[...]
    # hidden3 (output columns zero-padded to a full 128-lane tile -> dense store)
    out = jnp.dot(t2, w3_ref[...], preferred_element_type=jnp.float32) + b3_ref[...]

    o_ref[...] = out
    # Feed the output back as next step's hidden (padded lanes are exactly 0,
    # and the corresponding w1h rows are 0, so the recurrence is exact).
    h_ref[...] = out


def prepare_params(params, n_input):
    """One-time parameter massaging: f32 cast, bias -> (1, n), split of w1 into
    (x-part, hidden-part) and zero-padding to lane-dense multiples of 128."""
    w1, b1, w2, b2, w3, b3 = params
    n_hidden = w2.shape[0]
    n_output = w3.shape[1]
    n_out_pad = _round_up(n_output, LANES)
    f32 = jnp.float32

    w1 = w1.astype(f32)
    w1x = w1[:n_input, :]                                             # (n_input, n_hidden)
    w1h = jnp.zeros((n_out_pad, n_hidden), f32).at[:n_output, :].set(
        w1[n_input:, :])                                              # zero-padded rows
    b1 = b1.reshape(1, n_hidden).astype(f32)
    w2 = w2.astype(f32)
    b2 = b2.reshape(1, n_hidden).astype(f32)
    w3p = jnp.zeros((n_hidden, n_out_pad), f32).at[:, :n_output].set(w3.astype(f32))
    b3p = jnp.zeros((1, n_out_pad), f32).at[:, :n_output].set(
        b3.reshape(1, n_output).astype(f32))
    # TODO(synk): cast weights to bf16 here (accumulation stays f32 via
    # preferred_element_type) once the batch is large enough to be MXU-bound.
    return (w1x, w1h, b1, w2, b2, w3p, b3p)


def rnn_forward_sequence(xs, h0, prepared, n_output):
    """xs: (T, B, n_input) f32, h0: (B, n_output) f32.
    Returns per-step outputs (T, B, n_output); recurrence is h_{t+1} = out_t."""
    w1x, w1h, b1, w2, b2, w3p, b3p = prepared
    T, B, n_input = xs.shape
    n_hidden = w2.shape[0]
    n_out_pad = w3p.shape[1]

    # Lane-pad the initial hidden once, outside the kernel.
    h0p = jnp.zeros((B, n_out_pad), jnp.float32).at[:, :n_output].set(
        h0.astype(jnp.float32))

    whole = lambda t: (0, 0)  # weights / biases / h0: same block every step -> DMA'd once

    flops = 2 * T * B * (n_input * n_hidden + n_out_pad * n_hidden
                         + n_hidden * n_hidden + n_hidden * n_out_pad)
    bytes_accessed = 4 * (xs.size + h0p.size + w1x.size + w1h.size + b1.size
                          + w2.size + b2.size + w3p.size + b3p.size
                          + T * B * n_out_pad)

    out = pl.pallas_call(
        _rnn_seq_kernel,
        out_shape=jax.ShapeDtypeStruct((T, B, n_out_pad), jnp.float32),
        grid=(T,),
        in_specs=[
            pl.BlockSpec((None, B, n_input), lambda t: (t, 0, 0)),   # x_t streamed per step
            pl.BlockSpec((B, n_out_pad), whole),                     # h0 (lane-padded)
            pl.BlockSpec((n_input, n_hidden), whole),                # w1 (x part)
            pl.BlockSpec((n_out_pad, n_hidden), whole),              # w1 (hidden part, padded)
            pl.BlockSpec((1, n_hidden), whole),                      # b1
            pl.BlockSpec((n_hidden, n_hidden), whole),               # w2
            pl.BlockSpec((1, n_hidden), whole),                      # b2
            pl.BlockSpec((n_hidden, n_out_pad), whole),              # w3 (lane-padded)
            pl.BlockSpec((1, n_out_pad), whole),                     # b3 (lane-padded)
        ],
        out_specs=pl.BlockSpec((None, B, n_out_pad), lambda t: (t, 0, 0)),
        scratch_shapes=[pltpu.VMEM((B, n_out_pad), jnp.float32)],    # persistent hidden
        compiler_params=pltpu.CompilerParams(
            dimension_semantics=("arbitrary",)),                     # sequential recurrence
        cost_estimate=pl.CostEstimate(flops=flops, transcendentals=0,
                                      bytes_accessed=bytes_accessed),
    )(xs, h0p, w1x, w1h, b1, w2, b2, w3p, b3p)
    # TODO(synk): for large batches, tile B with a leading "parallel" grid axis to
    # shard across v7x's two TensorCores.
    return out[:, :, :n_output]


def rnn_forward(x, hidden, prepared, n_output):
    """Single-step forward matching the PyTorch module: x (n_input,), hidden (1, n_output)."""
    n_input = x.shape[-1]
    xs = x.reshape(1, 1, n_input).astype(jnp.float32)
    h0 = hidden.reshape(1, n_output).astype(jnp.float32)
    return rnn_forward_sequence(xs, h0, prepared, n_output).reshape(n_output)


# ----------------------------- reference & init -----------------------------

def init_params(key, n_input, n_hidden, n_output):
    """Shapes match nn.Linear but stored transposed: W is (in_features, out_features)."""
    k1, k2, k3, k4, k5, k6 = jax.random.split(key, 6)
    fan1 = n_input + n_output

    def u(k, shape, fan):
        lim = 1.0 / (fan ** 0.5)
        return jax.random.uniform(k, shape, jnp.float32, -lim, lim)

    w1 = u(k1, (fan1, n_hidden), fan1)
    b1 = u(k2, (n_hidden,), fan1)
    w2 = u(k3, (n_hidden, n_hidden), n_hidden)
    b2 = u(k4, (n_hidden,), n_hidden)
    w3 = u(k5, (n_hidden, n_output), n_hidden)
    b3 = u(k6, (n_output,), n_hidden)
    return (w1, b1, w2, b2, w3, b3)


def _linear_ref(x, w, b):
    return jnp.dot(x, w, precision=jax.lax.Precision.HIGHEST) + b


def rnn_step_ref(x, h, params):
    w1, b1, w2, b2, w3, b3 = params
    comb = jnp.concatenate([x, h], axis=-1)
    t = _linear_ref(comb, w1, b1)
    t = _linear_ref(t, w2, b2)
    return _linear_ref(t, w3, b3)


def rnn_sequence_ref(xs, h0, params):
    def step(h, x):
        o = rnn_step_ref(x, h, params)
        return o, o
    _, outs = jax.lax.scan(step, h0, xs)
    return outs


if __name__ == "__main__":
    n_input, n_hidden, n_output = 16, 32, 8
    T, B = 16, 8

    key = jax.random.PRNGKey(0)
    kx, kp = jax.random.split(key)
    params = init_params(kp, n_input, n_hidden, n_output)
    prepared = prepare_params(params, n_input)

    xs = jax.random.normal(kx, (T, B, n_input), dtype=jnp.float32)
    h0 = jnp.zeros((B, n_output), dtype=jnp.float32)     # batched RNN.initHidden()

    outs = jax.block_until_ready(rnn_forward_sequence(xs, h0, prepared, n_output))
    ref = rnn_sequence_ref(xs, h0, params)
    assert outs.shape == (T, B, n_output)
    assert jnp.allclose(outs, ref, atol=1e-4, rtol=1e-4), (outs, ref)

    # Single-step call matching the original module's forward() exactly.
    x1 = xs[0, 0]
    h1 = jnp.zeros((1, n_output), dtype=jnp.float32)     # RNN.initHidden()
    o1 = jax.block_until_ready(rnn_forward(x1, h1, prepared, n_output))
    r1 = rnn_step_ref(x1.reshape(1, n_input), h1, params).reshape(n_output)
    assert o1.shape == (n_output,)
    assert jnp.allclose(o1, r1, atol=1e-4, rtol=1e-4), (o1, r1)

    print("KERNEL_OK")
</pallas_src>

<mosaic_0001>
module attributes {stable_mosaic.version = 11 : i64} {
  func.func @_rnn_seq_kernel(%arg0: i32, %arg1: memref<1x8x16xf32, #tpu.memory_space<vmem>>, %arg2: memref<8x128xf32, #tpu.memory_space<vmem>>, %arg3: memref<16x32xf32, #tpu.memory_space<vmem>>, %arg4: memref<128x32xf32, #tpu.memory_space<vmem>>, %arg5: memref<1x32xf32, #tpu.memory_space<vmem>>, %arg6: memref<32x32xf32, #tpu.memory_space<vmem>>, %arg7: memref<1x32xf32, #tpu.memory_space<vmem>>, %arg8: memref<32x128xf32, #tpu.memory_space<vmem>>, %arg9: memref<1x128xf32, #tpu.memory_space<vmem>>, %arg10: memref<1x8x128xf32, #tpu.memory_space<vmem>>, %arg11: memref<8x128xf32, #tpu.memory_space<vmem>>) attributes {dimension_semantics = [#tpu.dimension_semantics<arbitrary>], iteration_bounds = array<i64: 16>, scalar_prefetch = 0 : i64, scratch_operands = 1 : i64, tpu.core_type = #tpu.core_type<tc>, window_params = [{transform_indices = @transform_0, window_bounds = array<i64: 1, 8, 16>}, {pipeline_mode = #tpu.pipeline_mode<synchronous>, transform_indices = @transform_1, window_bounds = array<i64: 8, 128>}, {pipeline_mode = #tpu.pipeline_mode<synchronous>, transform_indices = @transform_2, window_bounds = array<i64: 16, 32>}, {pipeline_mode = #tpu.pipeline_mode<synchronous>, transform_indices = @transform_3, window_bounds = array<i64: 128, 32>}, {pipeline_mode = #tpu.pipeline_mode<synchronous>, transform_indices = @transform_4, window_bounds = array<i64: 1, 32>}, {pipeline_mode = #tpu.pipeline_mode<synchronous>, transform_indices = @transform_5, window_bounds = array<i64: 32, 32>}, {pipeline_mode = #tpu.pipeline_mode<synchronous>, transform_indices = @transform_6, window_bounds = array<i64: 1, 32>}, {pipeline_mode = #tpu.pipeline_mode<synchronous>, transform_indices = @transform_7, window_bounds = array<i64: 32, 128>}, {pipeline_mode = #tpu.pipeline_mode<synchronous>, transform_indices = @transform_8, window_bounds = array<i64: 1, 128>}, {transform_indices = @transform_9, window_bounds = array<i64: 1, 8, 128>}]} {
    %c0_i32 = arith.constant 0 : i32
    %0 = arith.cmpi eq, %arg0, %c0_i32 : i32
    %1 = arith.extui %0 : i1 to i32
    %c0_i32_0 = arith.constant 0 : i32
    %2 = arith.cmpi ne, %1, %c0_i32_0 : i32
    scf.if %2 {
      %c0_27 = arith.constant 0 : index
      %c0_28 = arith.constant 0 : index
      %28 = vector.load %arg2[%c0_27, %c0_28] : memref<8x128xf32, #tpu.memory_space<vmem>>, vector<8x128xf32>
      %c0_29 = arith.constant 0 : index
      %c0_30 = arith.constant 0 : index
      %29 = vector.load %arg11[%c0_29, %c0_30] : memref<8x128xf32, #tpu.memory_space<vmem>>, vector<8x128xf32>
      tpu.vector_store %arg11[%c0_29, %c0_30], %28 {strides = array<i32>} : memref<8x128xf32, #tpu.memory_space<vmem>>, vector<8x128xf32>,
    } else {
    }
    %c0 = arith.constant 0 : index
    %c0_1 = arith.constant 0 : index
    %c0_2 = arith.constant 0 : index
    %3 = vector.load %arg1[%c0, %c0_1, %c0_2] : memref<1x8x16xf32, #tpu.memory_space<vmem>>, vector<1x8x16xf32>
    %4 = vector.shape_cast %3 : vector<1x8x16xf32> to vector<8x16xf32>
    %c0_3 = arith.constant 0 : index
    %c0_4 = arith.constant 0 : index
    %5 = vector.load %arg3[%c0_3, %c0_4] : memref<16x32xf32, #tpu.memory_space<vmem>>, vector<16x32xf32>
    %cst = arith.constant dense<0.000000e+00> : vector<8x32xf32>
    %6 = tpu.matmul %4, %5, %cst {dimension_numbers = #tpu.dot_dimension_numbers<[1], [0], [0], [1], [0, 0, 1, 1], [], []>} : vector<8x16xf32>, vector<16x32xf32>, vector<8x32xf32> -> vector<8x32xf32>
    %c0_5 = arith.constant 0 : index
    %c0_6 = arith.constant 0 : index
    %7 = vector.load %arg11[%c0_5, %c0_6] : memref<8x128xf32, #tpu.memory_space<vmem>>, vector<8x128xf32>
    %c0_7 = arith.constant 0 : index
    %c0_8 = arith.constant 0 : index
    %8 = vector.load %arg4[%c0_7, %c0_8] : memref<128x32xf32, #tpu.memory_space<vmem>>, vector<128x32xf32>
    %cst_9 = arith.constant dense<0.000000e+00> : vector<8x32xf32>
    %9 = tpu.matmul %7, %8, %cst_9 {dimension_numbers = #tpu.dot_dimension_numbers<[1], [0], [0], [1], [0, 0, 1, 1], [], []>} : vector<8x128xf32>, vector<128x32xf32>, vector<8x32xf32> -> vector<8x32xf32>
    %10 = arith.addf %6, %9 : vector<8x32xf32>
    %c0_10 = arith.constant 0 : index
    %c0_11 = arith.constant 0 : index
    %11 = vector.load %arg5[%c0_10, %c0_11] : memref<1x32xf32, #tpu.memory_space<vmem>>, vector<1x32xf32>
    %12 = vector.broadcast %11 : vector<1x32xf32> to vector<8x32xf32>
    %13 = arith.addf %10, %12 : vector<8x32xf32>
    %c0_12 = arith.constant 0 : index
    %c0_13 = arith.constant 0 : index
    %14 = vector.load %arg6[%c0_12, %c0_13] : memref<32x32xf32, #tpu.memory_space<vmem>>, vector<32x32xf32>
    %cst_14 = arith.constant dense<0.000000e+00> : vector<8x32xf32>
    %15 = tpu.matmul %13, %14, %cst_14 {dimension_numbers = #tpu.dot_dimension_numbers<[1], [0], [0], [1], [0, 0, 1, 1], [], []>} : vector<8x32xf32>, vector<32x32xf32>, vector<8x32xf32> -> vector<8x32xf32>
    %c0_15 = arith.constant 0 : index
    %c0_16 = arith.constant 0 : index
    %16 = vector.load %arg7[%c0_15, %c0_16] : memref<1x32xf32, #tpu.memory_space<vmem>>, vector<1x32xf32>
    %17 = vector.broadcast %16 : vector<1x32xf32> to vector<8x32xf32>
    %18 = arith.addf %15, %17 : vector<8x32xf32>
    %c0_17 = arith.constant 0 : index
    %c0_18 = arith.constant 0 : index
    %19 = vector.load %arg8[%c0_17, %c0_18] : memref<32x128xf32, #tpu.memory_space<vmem>>, vector<32x128xf32>
    %cst_19 = arith.constant dense<0.000000e+00> : vector<8x128xf32>
    %20 = tpu.matmul %18, %19, %cst_19 {dimension_numbers = #tpu.dot_dimension_numbers<[1], [0], [0], [1], [0, 0, 1, 1], [], []>} : vector<8x32xf32>, vector<32x128xf32>, vector<8x128xf32> -> vector<8x128xf32>
    %c0_20 = arith.constant 0 : index
    %c0_21 = arith.constant 0 : index
    %21 = vector.load %arg9[%c0_20, %c0_21] : memref<1x128xf32, #tpu.memory_space<vmem>>, vector<1x128xf32>
    %22 = vector.broadcast %21 : vector<1x128xf32> to vector<8x128xf32>
    %23 = arith.addf %20, %22 : vector<8x128xf32>
    %c0_22 = arith.constant 0 : index
    %c0_23 = arith.constant 0 : index
    %c0_24 = arith.constant 0 : index
    %24 = vector.load %arg10[%c0_22, %c0_23, %c0_24] : memref<1x8x128xf32, #tpu.memory_space<vmem>>, vector<1x8x128xf32>
    %25 = vector.shape_cast %24 : vector<1x8x128xf32> to vector<8x128xf32>
    %26 = vector.shape_cast %23 : vector<8x128xf32> to vector<1x8x128xf32>
    tpu.vector_store %arg10[%c0_22, %c0_23, %c0_24], %26 {strides = array<i32>} : memref<1x8x128xf32, #tpu.memory_space<vmem>>, vector<1x8x128xf32>,
    %c0_25 = arith.constant 0 : index
    %c0_26 = arith.constant 0 : index
    %27 = vector.load %arg11[%c0_25, %c0_26] : memref<8x128xf32, #tpu.memory_space<vmem>>, vector<8x128xf32>
    tpu.vector_store %arg11[%c0_25, %c0_26], %23 {strides = array<i32>} : memref<8x128xf32, #tpu.memory_space<vmem>>, vector<8x128xf32>,
    return
  }
  func.func @transform_0(%arg0: i32) -> (i32, i32, i32) {
    %c0_i32 = arith.constant 0 : i32
    %c0_i32_0 = arith.constant 0 : i32
    %c0_i32_1 = arith.constant 0 : i32
    return %arg0, %c0_i32, %c0_i32_0 : i32, i32, i32
  }
  func.func @transform_1(%arg0: i32) -> (i32, i32) {
    %c0_i32 = arith.constant 0 : i32
    %c0_i32_0 = arith.constant 0 : i32
    %c0_i32_1 = arith.constant 0 : i32
    return %c0_i32, %c0_i32_0 : i32, i32
  }
  func.func @transform_2(%arg0: i32) -> (i32, i32) {
    %c0_i32 = arith.constant 0 : i32
    %c0_i32_0 = arith.constant 0 : i32
    %c0_i32_1 = arith.constant 0 : i32
    return %c0_i32, %c0_i32_0 : i32, i32
  }
  func.func @transform_3(%arg0: i32) -> (i32, i32) {
    %c0_i32 = arith.constant 0 : i32
    %c0_i32_0 = arith.constant 0 : i32
    %c0_i32_1 = arith.constant 0 : i32
    return %c0_i32, %c0_i32_0 : i32, i32
  }
  func.func @transform_4(%arg0: i32) -> (i32, i32) {
    %c0_i32 = arith.constant 0 : i32
    %c0_i32_0 = arith.constant 0 : i32
    %c0_i32_1 = arith.constant 0 : i32
    return %c0_i32, %c0_i32_0 : i32, i32
  }
  func.func @transform_5(%arg0: i32) -> (i32, i32) {
    %c0_i32 = arith.constant 0 : i32
    %c0_i32_0 = arith.constant 0 : i32
    %c0_i32_1 = arith.constant 0 : i32
    return %c0_i32, %c0_i32_0 : i32, i32
  }
  func.func @transform_6(%arg0: i32) -> (i32, i32) {
    %c0_i32 = arith.constant 0 : i32
    %c0_i32_0 = arith.constant 0 : i32
    %c0_i32_1 = arith.constant 0 : i32
    return %c0_i32, %c0_i32_0 : i32, i32
  }
  func.func @transform_7(%arg0: i32) -> (i32, i32) {
    %c0_i32 = arith.constant 0 : i32
    %c0_i32_0 = arith.constant 0 : i32
    %c0_i32_1 = arith.constant 0 : i32
    return %c0_i32, %c0_i32_0 : i32, i32
  }
  func.func @transform_8(%arg0: i32) -> (i32, i32) {
    %c0_i32 = arith.constant 0 : i32
    %c0_i32_0 = arith.constant 0 : i32
    %c0_i32_1 = arith.constant 0 : i32
    return %c0_i32, %c0_i32_0 : i32, i32
  }
  func.func @transform_9(%arg0: i32) -> (i32, i32, i32) {
    %c0_i32 = arith.constant 0 : i32
    %c0_i32_0 = arith.constant 0 : i32
    %c0_i32_1 = arith.constant 0 : i32
    return %arg0, %c0_i32, %c0_i32_0 : i32, i32, i32
  }
}

</mosaic_0001>

<bundles_post_ra>
// kernel: tpu_custom_call.1
= control target key start
LH: loop header
LB: loop body
LE: loop exit
PB: predicated region body
PF: predicated region fallthrough
CT: control target
= control target key end

     0   :  { %14 = vsyncpa [#allocation4], 0  ;;  %s1582_s0 = inlined_call_operand.vmem [shape: f32[16,8,16], index: 0, kind: input, shape index: {}]   ;;  %s1583_s1 = inlined_call_operand.hbm [shape: f32[8,128], index: 1, kind: input, shape index: {}]   ;;  %s1584_s2 = inlined_call_operand.hbm [shape: f32[16,32], index: 2, kind: input, shape index: {}]   ;;  %s1585_s3 = inlined_call_operand.vmem [shape: f32[128,32], index: 3, kind: input, shape index: {}]   ;;  %s1586_s4 = inlined_call_operand.vmem [shape: f32[1,32], index: 4, kind: input, shape index: {}]   ;;  %s1587_s5 = inlined_call_operand.vmem [shape: f32[32,32], index: 5, kind: input, shape index: {}]   ;;  %s1588_s6 = inlined_call_operand.vmem [shape: f32[1,32], index: 6, kind: input, shape index: {}]   ;;  %s1589_s7 = inlined_call_operand.hbm [shape: f32[32,128], index: 7, kind: input, shape index: {}]   ;;  %s1590_s8 = inlined_call_operand.vmem [shape: f32[1,128], index: 8, kind: input, shape index: {}]   ;;  %s1591_s9 = inlined_call_operand.hbm [shape: f32[16,8,128], index: 9, kind: output, shape index: {}]  }
   0x1   :  { %15 = vsyncpa [#allocation7], 0 }
   0x2   :  { %16 = vsyncpa [#allocation5], 0 }
   0x3   :  { %18 = vsyncpa [#allocation5 + $0x1], 0  ;;  %s1269_s30 = smov 0   ;;  %s1271_s10 = smov 0  }
   0x4   :  { %s1273_s11 = smov 0   ;;  %s1275_s12 = smov 0  }
   0x5 LB: > { %1600 = sst [smem:[#allocation13_spill]] %s1196_s30  ;;  %s1290_s13 = sadd.s32 4294967295, %s1208_s12   ;;  %s1208_s12 = sphi %s1275_s12, %s1620_s12   ;;  %s1204_s11 = sphi %s1273_s11, %s1622_s11   ;;  %s1200_s10 = sphi %s1271_s10, %s1624_s10   ;;  %s1196_s30 = sphi %s1269_s30, %s1623_s30  }
   0x6   : > { %1601 = sst [smem:[#allocation14_spill]] %s1204_s11  ;;  %s823_s14 = sadd.s32 4294967294, %s1208_s12  }
   0x7   : > { %s1294_s15 = sadd.s32 1, %s1208_s12   ;;  %s225_s16 = sadd.s32 1, %s1204_s11 }
   0x8   : > { %1602 = sst [smem:[#allocation15_spill]] %s1294_s15  ;;  %s222_s17 = ssub.s32 %s1208_s12, %s1294_s15 }
   0x9   : > { %p235_p0 = scmp.ne.s32.totalorder %s1204_s11, %s1200_s10  ;;  %p223_p1 = scmp.eq.s32.totalorder %s222_s17, 0 }
   0xa   : > { %p236_p2 = scmp.eq.s32.totalorder %s1290_s13, 15  ;;  %p241_p3 = scmp.ne.s32.totalorder %s1200_s10, %s1196_s30 }
   0xb   : > { %p242_p4 = scmp.eq.s32.totalorder %s823_s14, 15  ;;  %p824_p7 = scmp.ge.s32.totalorder %s1208_s12, 1 }
   0xc   : > { %s1305_s18 = scalar_select %p223_p1, %s1204_s11, %s225_s16  }
   0xd   : > { %p1307_p5 = por %p236_p2, %p235_p0  ;;  %p1311_p6 = por %p242_p4, %p241_p3 }
   0xe   : > { %1603 = sst [smem:[#allocation16_spill]] %s1305_s18  ;;  %p249_p8 = scmp.lt.s32.totalorder %s1208_s12, 17 }
   0xf   : > { %s1604_s19 = scalar_select %p1307_p5, 1, 0 }
  0x10   : > { %s1605_s20 = scalar_select %p1311_p6, 1, 0 }
  0x11   : > { %p1592_p10 = scmp.eq.s32.totalorder %s1290_s13, 0  ;;  %p1319_p11 = pnand %p824_p7, %p249_p8 }
  0x12   : > { %1606 = sst [smem:[#allocation17_spill]] %s1605_s20  ;;  %s1210_s22 = smov [#allocation6]  }
  0x13   : > { %s1607_s21 = scalar_select %p1319_p11, 1, 0 }
  0x14   : > { %s272_s23 = sshll.u32 %s1210_s22, 4  ;;  %p993_p12 = pneg %p1319_p11  ;;  %s1325_s23 = int_to_ptr.vmem [resolvable:$true] %s272_s23 }
  0x15   : > { %s1211_s25 = smov [#allocation3]   ;;  %s1212_s27 = smov [#allocation8]  }
  0x16   : > { %p1329_p13 = pnand %p1592_p10, %p993_p12  ;;  %s262_s26 = sshll.u32 %s1211_s25, 4  ;;  %s1333_s26 = int_to_ptr.vmem [resolvable:$true] %s262_s26 }
  0x17   : > { %s1335_s28 = sshll.u32 %s1212_s27, 4  ;;  %s1054_s16 = scalar_lea.hbm %s1584_s2, 256  ;;  %s298_s28 = int_to_ptr.vmem [resolvable:$true] %s1335_s28 }
  0x18   : > { %p1055_p0 = scmp.ne.s32.totalorder %s1584_s2, %s1054_s16  ;;  %p1345_p1 = pneg %p1329_p13 }
  0x19   : > { %p1061_p4 = scmp.lt.u32.totalorder %s1054_s16, %s1584_s2 }
  0x1a   : > { %p1057_p2 = pnand %p1345_p1, %p1055_p0 }
  0x1c   : > { %p1058_p3 = pneg %p1057_p2 }
  0x1e   : > { %p1063_p7 = pnand %p1061_p4, %p1058_p3 }
  0x20   : > { %1066 = shalt.err (!%p1063_p7)
}
  0x21   : > { %s1067_s29 = scalar_lea.vmem %s1325_s23, 256  ;;  %p1075_p10 = scmp.lt.s32.totalorder %s1325_s23, %s1325_s23 }
  0x22   : > { %p1068_p8 = scmp.ne.s32.totalorder %s1325_s23, %s1067_s29  ;;  %p1076_p6 = scmp.lt.s32.totalorder %s1067_s29, %s1067_s29 }
  0x24   : > { %p1070_p12 = pnand %p1068_p8, %p1345_p1  ;;  %p1077_p0 = por %p1076_p6, %p1075_p10 }
  0x26   : > { %p1071_p9 = pneg %p1070_p12 }
  0x28   : > { %p1078_p2 = pnand %p1077_p0, %p1071_p9 }
  0x2a   : > { %1081 = shalt.err (!%p1078_p2)
}
  0x2b   : > { %s1213_s14 = smov 128   ;;  %s1214_s16 = smov 8  }
  0x2c   : > { %999 = dma.hbm_to_vmem [thread:$0]  (!%p1329_p13), %s1584_s2, 256, %s1325_s23, [#allocation7], %s1213_s14, %s1213_s14, %s1214_s16  }
  0x2d   : > { %s1082_s29 = scalar_lea.hbm %s1583_s1, 128 }
  0x2e   : > { %p1083_p6 = scmp.ne.s32.totalorder %s1583_s1, %s1082_s29  ;;  %p1089_p3 = scmp.lt.u32.totalorder %s1082_s29, %s1583_s1 }
  0x30   : > { %p1085_p9 = pnand %p1083_p6, %p1345_p1 }
  0x32   : > { %p1086_p10 = pneg %p1085_p9 }
  0x34   : > { %p1091_p4 = pnand %p1089_p3, %p1086_p10 }
  0x36   : > { %1094 = shalt.err (!%p1091_p4)
}
  0x37   : > { %s1095_s23 = scalar_lea.vmem %s1333_s26, 128  ;;  %p1103_p0 = scmp.lt.s32.totalorder %s1333_s26, %s1333_s26 }
  0x38   : > { %p1096_p7 = scmp.ne.s32.totalorder %s1333_s26, %s1095_s23  ;;  %p1104_p2 = scmp.lt.s32.totalorder %s1095_s23, %s1095_s23 }
  0x3a   : > { %p1098_p8 = pnand %p1096_p7, %p1345_p1  ;;  %p1105_p6 = por %p1104_p2, %p1103_p0 }
  0x3c   : > { %p1099_p12 = pneg %p1098_p8 }
  0x3e   : > { %p1106_p9 = pnand %p1105_p6, %p1099_p12 }
  0x40   : > { %1109 = shalt.err (!%p1106_p9)
}
  0x41   : > { %996 = dma.hbm_to_vmem [thread:$0]  (!%p1329_p13), %s1583_s1, 128, %s1333_s26, [#allocation4]  }
  0x42   : > { %s1110_s17 = scalar_lea.hbm %s1589_s7, 512 }
  0x43   : > { %p1111_p10 = scmp.ne.s32.totalorder %s1589_s7, %s1110_s17  ;;  %p1117_p7 = scmp.lt.u32.totalorder %s1110_s17, %s1589_s7 }
  0x45   : > { %p1113_p3 = pnand %p1111_p10, %p1345_p1 }
  0x47   : > { %p1114_p4 = pneg %p1113_p3 }
  0x49   : > { %p1119_p8 = pnand %p1117_p7, %p1114_p4 }
  0x4b   : > { %1122 = shalt.err (!%p1119_p8)
}
  0x4c   : > { %s1123_s23 = scalar_lea.vmem %s298_s28, 512  ;;  %p1131_p6 = scmp.lt.s32.totalorder %s298_s28, %s298_s28 }
  0x4d   : > { %p1124_p12 = scmp.ne.s32.totalorder %s298_s28, %s1123_s23  ;;  %p1132_p9 = scmp.lt.s32.totalorder %s1123_s23, %s1123_s23 }
  0x4f   : > { %p1126_p0 = pnand %p1124_p12, %p1345_p1  ;;  %p1133_p5 = por %p1132_p9, %p1131_p6 }
  0x51   : > { %p1127_p2 = pneg %p1126_p0 }
  0x53   : > { %p1134_p11 = pnand %p1133_p5, %p1127_p2 }
  0x55   : > { %1137 = shalt.err (!%p1134_p11)
}
  0x56   : > { %1002 = dma.hbm_to_vmem [thread:$0]  (!%p1329_p13), %s1589_s7, 512, %s298_s28, [#allocation7], %s1213_s14, %s1213_s14, %s1214_s16  }
  0x57   : > { %p1610_p10 = scmp.ne.s32.totalorder %s1607_s21, 0 }
  0x58   : > { %p1611_p1 = scmp.eq.s32.totalorder (!%p1610_p10), %s1290_s13, 0 }
  0x59   : > { %323 = sbr.rel (%p1610_p10) target bundleno = 802 (0x322), region = 56 }
  0x60   : > { %1183 = dma.done.wait (%p1611_p1), [#allocation4], 128   ;;  %p1612_p3 = pmov %p1611_p1 }
  0x61   : > { %p1613_p5 = pmov %p1611_p1 }
  0x62   : > { %1185 = vsyncadd (%p1612_p3), [#allocation4], 4294967168 }
  0x63   : > { %1187 = dma.done.wait (%p1613_p5), [#allocation7], 768   ;;  %p1614_p11 = pmov %p1611_p1 }
  0x64   : > { %s363_s18 = sand.u32 1, %s1200_s10   ;;  %p366_p13 = scmp.lt.s32.totalorder %s1290_s13, 15 }
  0x65   : > { %1189 = vsyncadd (%p1614_p11), [#allocation7], 4294966528  ;;  %s1428_s21 = sshll.u32 %s363_s18, 3  ;;  %p1615_p4 = scmp.ne.s32.totalorder %s1290_s13, 0 }
  0x66   : > { %s367_s24 = scalar_select %p366_p13, %s1290_s13, 15 }
  0x67   : > { %s365_s15 = scalar_lea.vmem [#allocation9], %s1428_s21  ;;  %373 = sbr.rel (%p1615_p4) target bundleno = 110 (0x6e), region = 72  ;;  %v374_v0 = vld [vmem:[#allocation3] sm:$0xff] (!%p1615_p4) }
  0x68   : > { %s834_s28 = sshll.u32 %s367_s24, 3  ;;  %375 = vst [vmem:[#allocation2] sm:$0xff] (!%p1615_p4), %v374_v0 }
  0x69   : > { %s1434_s11 = scalar_lea.vmem %s1582_s0, %s834_s28 }
  0x6e PF: > { %v380_v1 = vld [vmem:[%s1585_s3] sm:$0xff]  ;;  %v381_v2 = vld [vmem:[%s1585_s3 + $0x8] sm:$0xff]  ;;  %v382_v3 = vld [vmem:[%s1585_s3 + $0x10] sm:$0xff]  ;;  %v1215_v4 = vmov 0.0|0.0   ;;  %vm1216_vm0 = vmmov 0   ;;  %v1217_v7 = vmov 0.0  }
  0x6f   : > { %940 = vmatprep.subr.bf16.mxu0 %v1215_v4  ;;  %v941_v5 = vpack.c.bf16 %v381_v2, %v380_v1  ;;  %v383_v6 = vld [vmem:[%s1585_s3 + $0x18] sm:$0xff]  ;;  %964 = vmatprep.subr.bf16.mxu1 %v1215_v4  ;;  %v384_v9 = vld [vmem:[%s1585_s3 + $0x20] sm:$0xff]  ;;  %v385_v10 = vld [vmem:[%s1585_s3 + $0x28] sm:$0xff]  ;;  %vm466_vm1 = vcmask 130048   ;;  %vm559_vm2 = vcmask 261120   ;;  %s843_s29 = sshll.u32 %s1290_s13, 7 }
  0x70   : > { %915 = vmatprep.mubr.msk.f32.mxu1 %vm1216_vm0, %v1217_v7  ;;  %908 = vmatprep.mubr.msk.f32.mxu0 %vm1216_vm0, %v1217_v7  ;;  %v944_v8 = vpack.c.bf16 %v383_v6, %v382_v3  ;;  %v377_v11 = vld [vmem:[#allocation6] sm:$0xff]  ;;  %v378_v12 = vld [vmem:[#allocation6 + $0x8] sm:$0xff]  ;;  %v548_v14 = vld [vmem:[%s1587_s5] sm:$0xff]  ;;  %v947_v15 = vpack.c.bf16 %v385_v10, %v384_v9  ;;  %s733_s23 = sshll.u32 %s365_s15, 4  ;;  %s1536_s24 = scalar_lea.hbm %s1591_s9, %s843_s29  ;;  %s1538_s23 = int_to_ptr.vmem [resolvable:$true] %s733_s23 }
  0x71   : > { %942 = vmatpush3.bf16.msra.mxu0 %v941_v5  ;;  %v965_v13 = vpack.c.bf16 %v378_v12, %v377_v11  ;;  %v549_v16 = vld [vmem:[%s1587_s5 + $0x8] sm:$0xff]  ;;  %v386_v17 = vld [vmem:[%s1585_s3 + $0x30] sm:$0xff]  ;;  %v387_v18 = vld [vmem:[%s1585_s3 + $0x38] sm:$0xff]  ;;  %s720_s13 = scalar_lea.sflag [#allocation5], %s363_s18  ;;  %s1138_s28 = scalar_lea.vmem %s1538_s23, 128 }
  0x72   : > { %943 = vmatprep.subr.bf16.mxu0 %v1215_v4  ;;  %v376_v19 = vld [vmem:[%s1434_s11] sm:$0xff]  ;;  %v968_v20 = vpack.c.bf16 %v549_v16, %v548_v14  ;;  %v950_v21 = vpack.c.bf16 %v387_v18, %v386_v17  ;;  %v389_v23 = vld [vmem:[%s1585_s3 + $0x48] sm:$0xff]  ;;  %v390_v25 = vld [vmem:[%s1585_s3 + $0x50] sm:$0xff]  ;;  %p1139_p7 = scmp.ne.s32.totalorder %s1538_s23, %s1138_s28  ;;  %p1616_p8 = scmp.ne.s32.totalorder %s1604_s19, 0 }
  0x73   : > { %966 = vmatpush3.bf16.msra.mxu1 %v965_v13  ;;  %v388_v22 = vld [vmem:[%s1585_s3 + $0x40] sm:$0xff]  ;;  %v391_v26 = vld [vmem:[%s1585_s3 + $0x58] sm:$0xff]  ;;  %v393_v29 = vld [vmem:[%s1585_s3 + $0x68] sm:$0xff]  ;;  %s1218_s11 = smov [#allocation9]  }
  0x74   : > { %967 = vmatprep.subr.bf16.mxu1 %v1215_v4  ;;  %v953_v24 = vpack.c.bf16 %v389_v23, %v388_v22  ;;  %v956_v27 = vpack.c.bf16 %v391_v26, %v390_v25  ;;  %v392_v28 = vld [vmem:[%s1585_s3 + $0x60] sm:$0xff]  ;;  %v394_v31 = vld [vmem:[%s1585_s3 + $0x70] sm:$0xff]  ;;  %v395_v32 = vld [vmem:[%s1585_s3 + $0x78] sm:$0xff]  ;;  %p1140_p12 = pnand %p1139_p7, %p1616_p8  ;;  %s1142_s14 = sshll.u32 %s1218_s11, 4  ;;  %s1143_s14 = int_to_ptr.vmem [resolvable:$false] %s1142_s14 }
  0x75   : > { %945 = vmatpush3.bf16.msra.mxu0 %v944_v8  ;;  %v959_v30 = vpack.c.bf16 %v393_v29, %v392_v28  ;;  %v962_v33 = vpack.c.bf16 %v395_v32, %v394_v31  ;;  %v379_v34 = vld [vmem:[#allocation2] sm:$0xff]  ;;  %v550_v35 = vld [vmem:[%s1587_s5 + $0x10] sm:$0xff]  ;;  %v551_v36 = vld [vmem:[%s1587_s5 + $0x18] sm:$0xff]  ;;  %s1144_s16 = scalar_lea.vmem %s1143_s14, 256  ;;  %p1145_p2 = scmp.lt.s32.totalorder %s1538_s23, %s1143_s14 }
  0x76   : > { %946 = vmatprep.subr.bf16.mxu0 %v1215_v4  ;;  %916 = vmatmul.mubr.msk.f32.vlgmr.msra.gmra.mrb[0].mxu1 %vm466_vm1, %v376_v19  ;;  %v971_v37 = vpack.c.bf16 %v551_v36, %v550_v35  ;;  %v633_v40 = vld [vmem:[#allocation8] sm:$0xff]  ;;  %v634_v41 = vld [vmem:[#allocation8 + $0x8] sm:$0xff]  ;;  %v635_v48 = vld [vmem:[#allocation8 + $0x10] sm:$0xff]  ;;  %p1141_p0 = pneg %p1140_p12  ;;  %p1146_p6 = scmp.lt.s32.totalorder %s1144_s16, %s1138_s28 }
  0x77   : > { %969 = vmatpush3.bf16.msra.mxu1 %v968_v20  ;;  %926 = vmatprep.mubr.msk.f32.mxu1 %vm1216_vm0, %v1217_v7  ;;  %v837_v43 = vld [vmem:[%s1586_s4] ss:$0 sm:$0xff]  ;;  %v974_v46 = vpack.c.bf16 %v634_v41, %v633_v40  ;;  %v636_v49 = vld [vmem:[#allocation8 + $0x18] sm:$0xff] }
  0x78   : > { %970 = vmatprep.subr.bf16.mxu1 %v1215_v4  ;;  %v977_v50 = vpack.c.bf16 %v636_v49, %v635_v48  ;;  %v838_v51 = vld [vmem:[%s1588_s6] ss:$0 sm:$0xff]  ;;  %p1147_p9 = por %p1146_p6, %p1145_p2 }
  0x79   : > { %948 = vmatpush3.bf16.msra.mxu0 %v947_v15  ;;  %v840_v55 = vld [vmem:[%s1590_s8] ss:$0 sm:$0xff] }
  0x7a   : > { %949 = vmatprep.subr.bf16.mxu0 %v1215_v4  ;;  %p1148_p10 = pnand %p1147_p9, %p1141_p0 }
  0x7b   : > { %972 = vmatpush3.bf16.msra.mxu1 %v971_v37 }
  0x7c   : > { %973 = vmatprep.subr.bf16.mxu1 %v1215_v4 }
  0x7d   : > { %951 = vmatpush3.bf16.msra.mxu0 %v950_v21 }
  0x7e   : > { %952 = vmatprep.subr.bf16.mxu0 %v1215_v4 }
  0x81   : > { %954 = vmatpush3.bf16.msra.mxu0 %v953_v24 }
  0x82   : > { %955 = vmatprep.subr.bf16.mxu0 %v1215_v4 }
  0x85   : > { %957 = vmatpush3.bf16.msra.mxu0 %v956_v27 }
  0x86   : > { %958 = vmatprep.subr.bf16.mxu0 %v1215_v4 }
  0x89   : > { %960 = vmatpush3.bf16.msra.mxu0 %v959_v30 }
  0x8a   : > { %961 = vmatprep.subr.bf16.mxu0 %v1215_v4 }
  0x8d   : > { %963 = vmatpush3.bf16.msra.mxu0 %v962_v33 }
  0x90   : > { %909 = vmatmul.mubr.f32.vlgmr.msra.gmra.mrb[0].mxu0 %v379_v34 }
 0x149   : > { %v536_v38 = vpop.f32.mrb[0].mxu1 }
 0x14a   : > { %v917_v39 = vpop.f32.mrb[1].mxu1 }
 0x163   : > { %v462_v42 = vpop.f32.mrb[0].mxu0 }
 0x164   : > { %v537_v44 = vadd.f32 %v536_v38, %v462_v42  ;;  %v910_v45 = vpop.f32.mrb[1].mxu0 }
 0x166   : > { %v547_v47 = vadd.f32 %v837_v43, %v537_v44 }
 0x168   : > { %927 = vmatmul.mubr.msk.f32.vlgmr.msra.gmra.mrb[2].mxu1 %vm559_vm2, %v547_v47 }
 0x169   : > { %975 = vmatpush3.bf16.msra.mxu1 %v974_v46  ;;  %937 = vmatprep.mubr.msk.f32.mxu1 %vm1216_vm0, %v1217_v7 }
 0x16a   : > { %976 = vmatprep.subr.bf16.mxu1 %v1215_v4 }
 0x16d   : > { %978 = vmatpush3.bf16.msra.mxu1 %v977_v50 }
 0x23b   : > { %v629_v52 = vpop.f32.mrb[2].mxu1 }
 0x23c   : > { %v630_v53 = vadd.f32 %v838_v51, %v629_v52  ;;  %v928_v54 = vpop.f32.mrb[3].mxu1 }
 0x23e   : > { %938 = vmatmul.mubr.msk.f32.vlgmr.msra.gmra.mrb[4].mxu1 %vm559_vm2, %v630_v53 }
 0x311   : > { %v713_v56 = vpop.f32.mrb[4].mxu1 }
 0x312   : > { %v714_v57 = vadd.f32 %v840_v55, %v713_v56  ;;  %v939_v58 = vpop.f32.mrb[5].mxu1 }
 0x314   : > { %717 = vst [vmem:[%s365_s15] sm:$0xff] %v714_v57  ;;  %718 = vst [vmem:[#allocation2] sm:$0xff] %v714_v57 }
 0x315   : > { %1151 = shalt.err (!%p1148_p10)
}
 0x316   : > { %s1152_s18 = scalar_lea.hbm %s1536_s24, 128  ;;  %s1156_s20 = scalar_lea.hbm %s1591_s9, 2048 }
 0x317   : > { %p1153_p1 = scmp.ne.s32.totalorder %s1536_s24, %s1152_s18  ;;  %p1157_p11 = scmp.lt.u32.totalorder %s1536_s24, %s1591_s9 }
 0x318   : > { %p1158_p13 = scmp.lt.u32.totalorder %s1156_s20, %s1152_s18  ;;  %p1160_p7 = scmp.lt.u32.totalorder %s1152_s18, %s1536_s24 }
 0x319   : > { %p1154_p3 = pnand %p1153_p1, %p1616_p8 }
 0x31a   : > { %p1159_p4 = por %p1158_p13, %p1157_p11 }
 0x31b   : > { %p1155_p5 = pneg %p1154_p3 }
 0x31c   : > { %p1161_p12 = por %p1160_p7, %p1159_p4 }
 0x31e   : > { %p1162_p0 = pnand %p1161_p12, %p1155_p5 }
 0x320   : > { %1165 = shalt.err (!%p1162_p0)
}
 0x321   : > { %991 = dma.vmem_to_hbm [thread:$0]  (%p1616_p8), %s1538_s23, 128, %s1536_s24, %s720_s13  }
 0x322 PF: > { %s1617_s25 = sld [smem:[#allocation13_spill]]  ;;  %s1618_s27 = sld [smem:[#allocation17_spill]] }
 0x323   : > { %p1013_p2 = scmp.ge.s32.totalorder %s1208_s12, 2 }
 0x328   : > { %s745_s29 = sand.u32 1, %s1617_s25   ;;  %p1619_p6 = scmp.ne.s32.totalorder %s1618_s27, 0 }
 0x329   : > { %s746_s26 = scalar_lea.sflag [#allocation5], %s745_s29 }
 0x32a   : > { %p1004_p9 = pnand %p1013_p2, %p1619_p6 }
 0x32c   : > { %1191 = dma.done.wait (!%p1004_p9), %s746_s26, 128  }
 0x32d   : > { %1193 = vsyncadd (!%p1004_p9), %s746_s26, 4294967168  ;;  %s1620_s12 = sld [smem:[#allocation15_spill]]  ;;  %s1621_s28 = sld [smem:[#allocation14_spill]] }
 0x32e   : > { %s1622_s11 = sld [smem:[#allocation16_spill]]  ;;  %s1623_s30 = smov %s1200_s10 }
 0x333   : > { %p21_p10 = scmp.ge.s32.totalorder %s1620_s12, 18   ;;  %s1624_s10 = smov %s1621_s28 }
 0x335   :  { %23 = sbr.rel (!%p21_p10) target bundleno = 5 (0x5), region = 108 }
 0x33c   :  { %751 = vsyncpa [#allocation4], 1 }
 0x33d   :  { %753 = vsyncpa [#allocation4 + $0x1], 1 }
 0x33e   :  { %754 = vsyncpa [#allocation7], 1 }
 0x33f   :  { %755 = vsyncpa [#allocation5], 1 }
 0x340   :  { %757 = vsyncpa [#allocation5 + $0x1], 1 }

</bundles_post_ra>
